<compile_context>
chip_gen: v6e
topology: v6e:2x2x1
jax: 0.10.0
libtpu: 0.0.40
codegen_flags: <defaults>
</compile_context>

<pallas_src>
import math

import jax
import jax.numpy as jnp
from jax import lax
from jax.experimental import pallas as pl
from jax.experimental.pallas import tpu as pltpu

# ---- sizes (small, consistent with the module) -------------------------------
B = 2                    # visual batch
C, HH, WW = 4, 16, 16    # image NCHW
VIS_OUT = 64             # visual_model.output_size
VIS_PROJ = 512           # __visual_linear out features
S = 8                    # text sequence length
HIDDEN = 32              # text_model.config.hidden_size
FUSE = 256               # fusion layer width
NUM_LABELS = 4           # num_labels
OUT_PAD = 128            # lane-dense padded output width (>= NUM_LABELS)
VOCAB = 100              # stand-in embedding vocab
VOCAB_PAD = 104          # sublane-aligned vocab rows (ids < VOCAB, padding never read)

EPS_NORM = 1e-12         # F.normalize eps
EPS_LN = 1e-5            # nn.LayerNorm default eps
INV_SQRT2 = 1.0 / math.sqrt(2.0)


# ---- Pallas kernel: embedding gather + visual stand-in + the whole head ------
def combined_head_kernel(ids_ref,                       # SMEM (S,) int32 (scalar prefetch)
                         img_ref, emb_ref,
                         w_vm_ref, w_vis_ref,
                         wft_ref, wfv_ref,
                         wo_ref, pk_ref,
                         out_ref):
    b = img_ref.shape[0]
    s = ids_ref.shape[0]

    # Packed f32 row-vectors: one (8, 512) operand instead of five tiny ones.
    pk = pk_ref[...]
    b_vis = pk[0:1, :]             # (1, 512)  (b_vm already folded in offline)
    b_fuse = pk[1:2, :FUSE]        # (1, 256)
    gamma = pk[2:3, :FUSE]         # (1, 256)
    beta = pk[3:4, :FUSE]          # (1, 256)
    b_out = pk[4:5, :OUT_PAD]      # (1, 128), real values in first NUM_LABELS lanes

    # text_model stand-in (fused): gather S rows from the VMEM embedding table
    # using token ids read as scalars from SMEM.
    rows = [emb_ref[pl.ds(ids_ref[i], 1), :] for i in range(s)]
    t = jnp.concatenate(rows, axis=0)                                 # (S, H) f32

    # visual_model stand-in (fused): flatten done in wrapper, linear here.
    # bf16 weights on the MXU, f32 accumulation; b_vm folded into b_vis offline.
    vis = jnp.dot(img_ref[...].astype(jnp.bfloat16), w_vm_ref[...],
                  preferred_element_type=jnp.float32)                 # (B, 64)

    # __visual_linear: (B, 64) @ (64, 512) + b_vis'
    v = jnp.dot(vis.astype(jnp.bfloat16), w_vis_ref[...],
                preferred_element_type=jnp.float32) + b_vis           # (B, 512)
    # F.normalize(p=2, dim=-1): x / max(||x||, eps) == x * rsqrt(max(ss, eps^2))
    v = v * lax.rsqrt(jnp.maximum(jnp.sum(v * v, axis=-1, keepdims=True),
                                  EPS_NORM * EPS_NORM))

    # normalize text hidden states
    t = t * lax.rsqrt(jnp.maximum(jnp.sum(t * t, axis=-1, keepdims=True),
                                  EPS_NORM * EPS_NORM))

    # fusion linear on the concatenation, done as a split matmul:
    #   cat([t, v]) @ W_fuse == t @ W_fuse[:H] + v @ W_fuse[H:]
    t_part = jnp.dot(t.astype(jnp.bfloat16), wft_ref[...],
                     preferred_element_type=jnp.float32)              # (S, 256)
    v_part = jnp.dot(v.astype(jnp.bfloat16), wfv_ref[...],
                     preferred_element_type=jnp.float32) + b_fuse     # (B, 256), bias folded

    # Single 2-D (B*S, 256) slab (row = b*S + s); layout-preserving sublane merge.
    pre = (v_part[:, None, :] + t_part[None, :, :]).reshape(b * s, FUSE)

    # GELU (exact, erf-based — matches torch.nn.GELU default)
    x = 0.5 * pre * (1.0 + lax.erf(pre * INV_SQRT2))

    # LayerNorm(256)
    mu = jnp.mean(x, axis=-1, keepdims=True)
    xc = x - mu
    var = jnp.mean(xc * xc, axis=-1, keepdims=True)
    y = xc * lax.rsqrt(var + EPS_LN) * gamma + beta                   # (B*S, 256)

    # Dropout(0.4) -> identity in eval mode

    # __out_layer with lane-dense zero-padded bf16 weights: (B*S, 256) @ (256, 128) + b
    out_ref[...] = jnp.dot(y.astype(jnp.bfloat16), wo_ref[...],
                           preferred_element_type=jnp.float32) + b_out


def combined_head(image, token_ids, packed):
    """image: (B, C, H, W); token_ids: (S,) int32 -> (B, S, NUM_LABELS)."""
    b = image.shape[0]
    s = token_ids.shape[0]
    img_flat = image.reshape(b, -1)                                   # (B, C*H*W)

    vmem = pl.BlockSpec(memory_space=pltpu.MemorySpace.VMEM)
    tensor_args = (img_flat, packed["emb"],
                   packed["w_vm"], packed["w_vis"],
                   packed["w_fuse_t"], packed["w_fuse_v"],
                   packed["w_out_pad"], packed["pk"])

    grid_spec = pltpu.PrefetchScalarGridSpec(
        num_scalar_prefetch=1,            # token ids -> SMEM, available before the body
        grid=(1,),
        in_specs=[vmem] * len(tensor_args),
        out_specs=vmem,
    )
    out = pl.pallas_call(
        combined_head_kernel,
        out_shape=jax.ShapeDtypeStruct((b * s, OUT_PAD), jnp.float32),
        grid_spec=grid_spec,
        compiler_params=pltpu.CompilerParams(dimension_semantics=("arbitrary",)),
    )(token_ids, *tensor_args)
    # Slice away the zero-padded lanes outside the kernel (kept lane-dense inside).
    return out.reshape(b, s, OUT_PAD)[:, :, :NUM_LABELS]


# ---- deterministic parameter construction -------------------------------------
def make_params(key):
    ks = jax.random.split(key, 12)
    scale = 0.05
    p = {
        # stand-in visual_model: flatten(NCHW) -> linear to VIS_OUT (fused into kernel)
        "w_vm": jax.random.normal(ks[0], (C * HH * WW, VIS_OUT), jnp.float32) * scale,
        "b_vm": jax.random.normal(ks[1], (VIS_OUT,), jnp.float32) * scale,
        # stand-in text_model: embedding table (fused into kernel)
        "emb": jax.random.normal(ks[2], (VOCAB, HIDDEN), jnp.float32) * scale,
        # __visual_linear(VIS_OUT, 512)
        "w_vis": jax.random.normal(ks[3], (VIS_OUT, VIS_PROJ), jnp.float32) * scale,
        "b_vis": jax.random.normal(ks[4], (VIS_PROJ,), jnp.float32) * scale,
        # __fusion_layer Linear(512 + HIDDEN, 256) split as [text-part; visual-part]
        "w_fuse_t": jax.random.normal(ks[5], (HIDDEN, FUSE), jnp.float32) * scale,
        "w_fuse_v": jax.random.normal(ks[6], (VIS_PROJ, FUSE), jnp.float32) * scale,
        "b_fuse": jax.random.normal(ks[7], (FUSE,), jnp.float32) * scale,
        # LayerNorm(256)
        "gamma": jnp.ones((FUSE,), jnp.float32)
                 + jax.random.normal(ks[8], (FUSE,), jnp.float32) * 0.01,
        "beta": jax.random.normal(ks[9], (FUSE,), jnp.float32) * 0.01,
        # __out_layer(256, num_labels)
        "w_out": jax.random.normal(ks[10], (FUSE, NUM_LABELS), jnp.float32) * scale,
        "b_out": jax.random.normal(ks[11], (NUM_LABELS,), jnp.float32) * scale,
    }
    return p


def pack_params(p):
    """One-time host-side packing:
       * fold b_vm through w_vis (f32), drop its packed row,
       * zero-pad the out layer to 128 lanes,
       * pack the remaining row-vectors into one (8, 512) f32 operand,
       * store the 5 weight matrices as bf16 (halves HBM traffic),
       * sublane-pad the embedding table (ids never touch the padding)."""
    b_vis_eff = p["b_vm"] @ p["w_vis"] + p["b_vis"]                     # (512,) f32 fold
    w_out_pad = jnp.zeros((FUSE, OUT_PAD), jnp.float32).at[:, :NUM_LABELS].set(p["w_out"])

    pk = jnp.zeros((8, VIS_PROJ), jnp.float32)
    pk = pk.at[0, :].set(b_vis_eff)
    pk = pk.at[1, :FUSE].set(p["b_fuse"])
    pk = pk.at[2, :FUSE].set(p["gamma"])
    pk = pk.at[3, :FUSE].set(p["beta"])
    pk = pk.at[4, :NUM_LABELS].set(p["b_out"])

    emb_pad = jnp.zeros((VOCAB_PAD, HIDDEN), jnp.float32).at[:VOCAB, :].set(p["emb"])

    return {
        "emb": emb_pad,                                   # f32 (feeds the exact normalize)
        "w_vm": p["w_vm"].astype(jnp.bfloat16),
        "w_vis": p["w_vis"].astype(jnp.bfloat16),
        "w_fuse_t": p["w_fuse_t"].astype(jnp.bfloat16),
        "w_fuse_v": p["w_fuse_v"].astype(jnp.bfloat16),
        "w_out_pad": w_out_pad.astype(jnp.bfloat16),
        "pk": pk,                                         # f32 biases / gamma / beta
    }


# ---- plain-JAX f32 reference (mirrors the PyTorch forward literally) -----------
def reference(image, text_hidden, p):
    visual_out = image.reshape(image.shape[0], -1) @ p["w_vm"] + p["b_vm"]
    v = visual_out @ p["w_vis"] + p["b_vis"]
    v = v / jnp.maximum(jnp.linalg.norm(v, axis=-1, keepdims=True), EPS_NORM)
    t = text_hidden / jnp.maximum(jnp.linalg.norm(text_hidden, axis=-1, keepdims=True), EPS_NORM)
    b, s = v.shape[0], t.shape[0]
    t_rep = jnp.broadcast_to(t[None], (b, s, HIDDEN))              # text_out.repeat(B,1,1)
    v_exp = jnp.broadcast_to(v[:, None, :], (b, s, VIS_PROJ))      # unsqueeze(1).expand
    combined = jnp.concatenate([t_rep, v_exp], axis=-1)
    w_fuse = jnp.concatenate([p["w_fuse_t"], p["w_fuse_v"]], axis=0)
    pre = combined @ w_fuse + p["b_fuse"]
    x = 0.5 * pre * (1.0 + jax.scipy.special.erf(pre * INV_SQRT2))
    mu = x.mean(-1, keepdims=True)
    var = ((x - mu) ** 2).mean(-1, keepdims=True)
    y = (x - mu) / jnp.sqrt(var + EPS_LN) * p["gamma"] + p["beta"]
    return y @ p["w_out"] + p["b_out"]


if __name__ == "__main__":
    key = jax.random.PRNGKey(0)
    k_img, k_ids, k_par = jax.random.split(key, 3)

    params = make_params(k_par)
    packed = pack_params(params)

    # inputs
    image = jax.random.normal(k_img, (B, C, HH, WW), jnp.float32)    # NCHW
    token_ids = jax.random.randint(k_ids, (1, S), 0, VOCAB, dtype=jnp.int32)  # text batch = 1

    out = combined_head(image, token_ids[0], packed)
    out = jax.block_until_ready(out)

    # f32 reference (kernel uses bf16 weights, hence the relaxed tolerance)
    text_hidden = params["emb"][token_ids[0]]
    ref = reference(image, text_hidden, params)

    assert out.shape == (B, S, NUM_LABELS), out.shape
    err = float(jnp.max(jnp.abs(out - ref)))
    assert jnp.allclose(out, ref, atol=5e-2, rtol=5e-2), err

    print("KERNEL_OK")
</pallas_src>

<mosaic_0001>
module attributes {stable_mosaic.version = 11 : i64} {
  func.func @combined_head_kernel(%arg0: i32, %arg1: memref<8xi32, #tpu.memory_space<smem>>, %arg2: memref<2x1024xf32, #tpu.memory_space<vmem>>, %arg3: memref<104x32xf32, #tpu.memory_space<vmem>>, %arg4: memref<1024x64xbf16, #tpu.memory_space<vmem>>, %arg5: memref<64x512xbf16, #tpu.memory_space<vmem>>, %arg6: memref<32x256xbf16, #tpu.memory_space<vmem>>, %arg7: memref<512x256xbf16, #tpu.memory_space<vmem>>, %arg8: memref<256x128xbf16, #tpu.memory_space<vmem>>, %arg9: memref<8x512xf32, #tpu.memory_space<vmem>>, %arg10: memref<16x128xf32, #tpu.memory_space<vmem>>) attributes {dimension_semantics = [#tpu.dimension_semantics<arbitrary>], iteration_bounds = array<i64: 1>, scalar_prefetch = 1 : i64, scratch_operands = 0 : i64, tpu.core_type = #tpu.core_type<tc>, window_params = [{pipeline_mode = #tpu.pipeline_mode<synchronous>, transform_indices = @transform_0, window_bounds = array<i64: 2, 1024>}, {pipeline_mode = #tpu.pipeline_mode<synchronous>, transform_indices = @transform_1, window_bounds = array<i64: 104, 32>}, {pipeline_mode = #tpu.pipeline_mode<synchronous>, transform_indices = @transform_2, window_bounds = array<i64: 1024, 64>}, {pipeline_mode = #tpu.pipeline_mode<synchronous>, transform_indices = @transform_3, window_bounds = array<i64: 64, 512>}, {pipeline_mode = #tpu.pipeline_mode<synchronous>, transform_indices = @transform_4, window_bounds = array<i64: 32, 256>}, {pipeline_mode = #tpu.pipeline_mode<synchronous>, transform_indices = @transform_5, window_bounds = array<i64: 512, 256>}, {pipeline_mode = #tpu.pipeline_mode<synchronous>, transform_indices = @transform_6, window_bounds = array<i64: 256, 128>}, {pipeline_mode = #tpu.pipeline_mode<synchronous>, transform_indices = @transform_7, window_bounds = array<i64: 8, 512>}, {pipeline_mode = #tpu.pipeline_mode<synchronous>, transform_indices = @transform_8, window_bounds = array<i64: 16, 128>}]} {
    %c0 = arith.constant 0 : index
    %c0_0 = arith.constant 0 : index
    %0 = vector.load %arg9[%c0, %c0_0] : memref<8x512xf32, #tpu.memory_space<vmem>>, vector<8x512xf32>
    %1 = vector.extract_strided_slice %0 {offsets = [0, 0], sizes = [1, 512], strides = [1, 1]} : vector<8x512xf32> to vector<1x512xf32>
    %2 = vector.extract_strided_slice %0 {offsets = [1, 0], sizes = [1, 256], strides = [1, 1]} : vector<8x512xf32> to vector<1x256xf32>
    %3 = vector.extract_strided_slice %0 {offsets = [2, 0], sizes = [1, 256], strides = [1, 1]} : vector<8x512xf32> to vector<1x256xf32>
    %4 = vector.extract_strided_slice %0 {offsets = [3, 0], sizes = [1, 256], strides = [1, 1]} : vector<8x512xf32> to vector<1x256xf32>
    %5 = vector.extract_strided_slice %0 {offsets = [4, 0], sizes = [1, 128], strides = [1, 1]} : vector<8x512xf32> to vector<1x128xf32>
    %c0_1 = arith.constant 0 : index
    %6 = memref.load %arg1[%c0_1] : memref<8xi32, #tpu.memory_space<smem>>
    %7 = arith.index_cast %6 : i32 to index
    %c0_2 = arith.constant 0 : index
    %8 = vector.load %arg3[%7, %c0_2] : memref<104x32xf32, #tpu.memory_space<vmem>>, vector<1x32xf32>
    %c1 = arith.constant 1 : index
    %9 = memref.load %arg1[%c1] : memref<8xi32, #tpu.memory_space<smem>>
    %10 = arith.index_cast %9 : i32 to index
    %c0_3 = arith.constant 0 : index
    %11 = vector.load %arg3[%10, %c0_3] : memref<104x32xf32, #tpu.memory_space<vmem>>, vector<1x32xf32>
    %c2 = arith.constant 2 : index
    %12 = memref.load %arg1[%c2] : memref<8xi32, #tpu.memory_space<smem>>
    %13 = arith.index_cast %12 : i32 to index
    %c0_4 = arith.constant 0 : index
    %14 = vector.load %arg3[%13, %c0_4] : memref<104x32xf32, #tpu.memory_space<vmem>>, vector<1x32xf32>
    %c3 = arith.constant 3 : index
    %15 = memref.load %arg1[%c3] : memref<8xi32, #tpu.memory_space<smem>>
    %16 = arith.index_cast %15 : i32 to index
    %c0_5 = arith.constant 0 : index
    %17 = vector.load %arg3[%16, %c0_5] : memref<104x32xf32, #tpu.memory_space<vmem>>, vector<1x32xf32>
    %c4 = arith.constant 4 : index
    %18 = memref.load %arg1[%c4] : memref<8xi32, #tpu.memory_space<smem>>
    %19 = arith.index_cast %18 : i32 to index
    %c0_6 = arith.constant 0 : index
    %20 = vector.load %arg3[%19, %c0_6] : memref<104x32xf32, #tpu.memory_space<vmem>>, vector<1x32xf32>
    %c5 = arith.constant 5 : index
    %21 = memref.load %arg1[%c5] : memref<8xi32, #tpu.memory_space<smem>>
    %22 = arith.index_cast %21 : i32 to index
    %c0_7 = arith.constant 0 : index
    %23 = vector.load %arg3[%22, %c0_7] : memref<104x32xf32, #tpu.memory_space<vmem>>, vector<1x32xf32>
    %c6 = arith.constant 6 : index
    %24 = memref.load %arg1[%c6] : memref<8xi32, #tpu.memory_space<smem>>
    %25 = arith.index_cast %24 : i32 to index
    %c0_8 = arith.constant 0 : index
    %26 = vector.load %arg3[%25, %c0_8] : memref<104x32xf32, #tpu.memory_space<vmem>>, vector<1x32xf32>
    %c7 = arith.constant 7 : index
    %27 = memref.load %arg1[%c7] : memref<8xi32, #tpu.memory_space<smem>>
    %28 = arith.index_cast %27 : i32 to index
    %c0_9 = arith.constant 0 : index
    %29 = vector.load %arg3[%28, %c0_9] : memref<104x32xf32, #tpu.memory_space<vmem>>, vector<1x32xf32>
    %30 = tpu.concatenate %8, %11, %14, %17, %20, %23, %26, %29 in 0 : vector<1x32xf32>, vector<1x32xf32>, vector<1x32xf32>, vector<1x32xf32>, vector<1x32xf32>, vector<1x32xf32>, vector<1x32xf32>, vector<1x32xf32> -> vector<8x32xf32>
    %c0_10 = arith.constant 0 : index
    %c0_11 = arith.constant 0 : index
    %31 = vector.load %arg2[%c0_10, %c0_11] : memref<2x1024xf32, #tpu.memory_space<vmem>>, vector<2x1024xf32>
    %32 = arith.truncf %31 : vector<2x1024xf32> to vector<2x1024xbf16>
    %c0_12 = arith.constant 0 : index
    %c0_13 = arith.constant 0 : index
    %33 = vector.load %arg4[%c0_12, %c0_13] : memref<1024x64xbf16, #tpu.memory_space<vmem>>, vector<1024x64xbf16>
    %cst = arith.constant dense<0.000000e+00> : vector<2x64xf32>
    %34 = tpu.matmul %32, %33, %cst {dimension_numbers = #tpu.dot_dimension_numbers<[1], [0], [0], [1], [0, 0, 1, 1], [], []>} : vector<2x1024xbf16>, vector<1024x64xbf16>, vector<2x64xf32> -> vector<2x64xf32>
    %35 = arith.truncf %34 : vector<2x64xf32> to vector<2x64xbf16>
    %c0_14 = arith.constant 0 : index
    %c0_15 = arith.constant 0 : index
    %36 = vector.load %arg5[%c0_14, %c0_15] : memref<64x512xbf16, #tpu.memory_space<vmem>>, vector<64x512xbf16>
    %cst_16 = arith.constant dense<0.000000e+00> : vector<2x512xf32>
    %37 = tpu.matmul %35, %36, %cst_16 {dimension_numbers = #tpu.dot_dimension_numbers<[1], [0], [0], [1], [0, 0, 1, 1], [], []>} : vector<2x64xbf16>, vector<64x512xbf16>, vector<2x512xf32> -> vector<2x512xf32>
    %38 = vector.broadcast %1 : vector<1x512xf32> to vector<2x512xf32>
    %39 = arith.addf %37, %38 : vector<2x512xf32>
    %40 = arith.mulf %39, %39 : vector<2x512xf32>
    %cst_17 = arith.constant dense<0.000000e+00> : vector<2xf32>
    %41 = vector.multi_reduction <add>, %40, %cst_17 [1] : vector<2x512xf32> to vector<2xf32>
    %42 = vector.shape_cast %41 : vector<2xf32> to vector<2x1xf32>
    %cst_18 = arith.constant 1.000000e-24 : f32
    %43 = vector.broadcast %cst_18 : f32 to vector<2x1xf32>
    %44 = arith.maximumf %42, %43 : vector<2x1xf32>
    %45 = math.rsqrt %44 : vector<2x1xf32>
    %46 = vector.broadcast %45 : vector<2x1xf32> to vector<2x512xf32>
    %47 = arith.mulf %39, %46 : vector<2x512xf32>
    %48 = arith.mulf %30, %30 : vector<8x32xf32>
    %cst_19 = arith.constant dense<0.000000e+00> : vector<8xf32>
    %49 = vector.multi_reduction <add>, %48, %cst_19 [1] : vector<8x32xf32> to vector<8xf32>
    %50 = vector.shape_cast %49 : vector<8xf32> to vector<8x1xf32>
    %cst_20 = arith.constant 1.000000e-24 : f32
    %51 = vector.broadcast %cst_20 : f32 to vector<8x1xf32>
    %52 = arith.maximumf %50, %51 : vector<8x1xf32>
    %53 = math.rsqrt %52 : vector<8x1xf32>
    %54 = vector.broadcast %53 : vector<8x1xf32> to vector<8x32xf32>
    %55 = arith.mulf %30, %54 : vector<8x32xf32>
    %56 = arith.truncf %55 : vector<8x32xf32> to vector<8x32xbf16>
    %c0_21 = arith.constant 0 : index
    %c0_22 = arith.constant 0 : index
    %57 = vector.load %arg6[%c0_21, %c0_22] : memref<32x256xbf16, #tpu.memory_space<vmem>>, vector<32x256xbf16>
    %cst_23 = arith.constant dense<0.000000e+00> : vector<8x256xf32>
    %58 = tpu.matmul %56, %57, %cst_23 {dimension_numbers = #tpu.dot_dimension_numbers<[1], [0], [0], [1], [0, 0, 1, 1], [], []>} : vector<8x32xbf16>, vector<32x256xbf16>, vector<8x256xf32> -> vector<8x256xf32>
    %59 = arith.truncf %47 : vector<2x512xf32> to vector<2x512xbf16>
    %c0_24 = arith.constant 0 : index
    %c0_25 = arith.constant 0 : index
    %60 = vector.load %arg7[%c0_24, %c0_25] : memref<512x256xbf16, #tpu.memory_space<vmem>>, vector<512x256xbf16>
    %cst_26 = arith.constant dense<0.000000e+00> : vector<2x256xf32>
    %61 = tpu.matmul %59, %60, %cst_26 {dimension_numbers = #tpu.dot_dimension_numbers<[1], [0], [0], [1], [0, 0, 1, 1], [], []>} : vector<2x512xbf16>, vector<512x256xbf16>, vector<2x256xf32> -> vector<2x256xf32>
    %62 = vector.broadcast %2 : vector<1x256xf32> to vector<2x256xf32>
    %63 = arith.addf %61, %62 : vector<2x256xf32>
    %64 = vector.shape_cast %63 : vector<2x256xf32> to vector<2x1x256xf32>
    %65 = vector.shape_cast %58 : vector<8x256xf32> to vector<1x8x256xf32>
    %66 = vector.broadcast %64 : vector<2x1x256xf32> to vector<2x8x256xf32>
    %67 = vector.broadcast %65 : vector<1x8x256xf32> to vector<2x8x256xf32>
    %68 = arith.addf %66, %67 : vector<2x8x256xf32>
    %69 = vector.shape_cast %68 : vector<2x8x256xf32> to vector<16x256xf32>
    %cst_27 = arith.constant 5.000000e-01 : f32
    %70 = vector.broadcast %cst_27 : f32 to vector<16x256xf32>
    %71 = arith.mulf %70, %69 : vector<16x256xf32>
    %cst_28 = arith.constant 0.707106769 : f32
    %72 = vector.broadcast %cst_28 : f32 to vector<16x256xf32>
    %73 = arith.mulf %69, %72 : vector<16x256xf32>
    %74 = math.erf %73 : vector<16x256xf32>
    %cst_29 = arith.constant 1.000000e+00 : f32
    %75 = vector.broadcast %cst_29 : f32 to vector<16x256xf32>
    %76 = arith.addf %75, %74 : vector<16x256xf32>
    %77 = arith.mulf %71, %76 : vector<16x256xf32>
    %cst_30 = arith.constant dense<0.000000e+00> : vector<16xf32>
    %78 = vector.multi_reduction <add>, %77, %cst_30 [1] : vector<16x256xf32> to vector<16xf32>
    %79 = vector.shape_cast %78 : vector<16xf32> to vector<16x1xf32>
    %cst_31 = arith.constant 2.560000e+02 : f32
    %80 = vector.broadcast %cst_31 : f32 to vector<16x1xf32>
    %81 = arith.divf %79, %80 : vector<16x1xf32>
    %82 = vector.broadcast %81 : vector<16x1xf32> to vector<16x256xf32>
    %83 = arith.subf %77, %82 : vector<16x256xf32>
    %84 = arith.mulf %83, %83 : vector<16x256xf32>
    %cst_32 = arith.constant dense<0.000000e+00> : vector<16xf32>
    %85 = vector.multi_reduction <add>, %84, %cst_32 [1] : vector<16x256xf32> to vector<16xf32>
    %86 = vector.shape_cast %85 : vector<16xf32> to vector<16x1xf32>
    %cst_33 = arith.constant 2.560000e+02 : f32
    %87 = vector.broadcast %cst_33 : f32 to vector<16x1xf32>
    %88 = arith.divf %86, %87 : vector<16x1xf32>
    %cst_34 = arith.constant 9.99999974E-6 : f32
    %89 = vector.broadcast %cst_34 : f32 to vector<16x1xf32>
    %90 = arith.addf %88, %89 : vector<16x1xf32>
    %91 = math.rsqrt %90 : vector<16x1xf32>
    %92 = vector.broadcast %91 : vector<16x1xf32> to vector<16x256xf32>
    %93 = arith.mulf %83, %92 : vector<16x256xf32>
    %94 = vector.broadcast %3 : vector<1x256xf32> to vector<16x256xf32>
    %95 = arith.mulf %93, %94 : vector<16x256xf32>
    %96 = vector.broadcast %4 : vector<1x256xf32> to vector<16x256xf32>
    %97 = arith.addf %95, %96 : vector<16x256xf32>
    %98 = arith.truncf %97 : vector<16x256xf32> to vector<16x256xbf16>
    %c0_35 = arith.constant 0 : index
    %c0_36 = arith.constant 0 : index
    %99 = vector.load %arg8[%c0_35, %c0_36] : memref<256x128xbf16, #tpu.memory_space<vmem>>, vector<256x128xbf16>
    %cst_37 = arith.constant dense<0.000000e+00> : vector<16x128xf32>
    %100 = tpu.matmul %98, %99, %cst_37 {dimension_numbers = #tpu.dot_dimension_numbers<[1], [0], [0], [1], [0, 0, 1, 1], [], []>} : vector<16x256xbf16>, vector<256x128xbf16>, vector<16x128xf32> -> vector<16x128xf32>
    %101 = vector.broadcast %5 : vector<1x128xf32> to vector<16x128xf32>
    %102 = arith.addf %100, %101 : vector<16x128xf32>
    %c0_38 = arith.constant 0 : index
    %c0_39 = arith.constant 0 : index
    %103 = vector.load %arg10[%c0_38, %c0_39] : memref<16x128xf32, #tpu.memory_space<vmem>>, vector<16x128xf32>
    tpu.vector_store %arg10[%c0_38, %c0_39], %102 {strides = array<i32>} : memref<16x128xf32, #tpu.memory_space<vmem>>, vector<16x128xf32>,
    return
  }
  func.func @transform_0(%arg0: i32, %arg1: memref<8xi32, #tpu.memory_space<smem>>) -> (i32, i32) {
    %c0_i32 = arith.constant 0 : i32
    %c0_i32_0 = arith.constant 0 : i32
    %c0_i32_1 = arith.constant 0 : i32
    return %c0_i32, %c0_i32_0 : i32, i32
  }
  func.func @transform_1(%arg0: i32, %arg1: memref<8xi32, #tpu.memory_space<smem>>) -> (i32, i32) {
    %c0_i32 = arith.constant 0 : i32
    %c0_i32_0 = arith.constant 0 : i32
    %c0_i32_1 = arith.constant 0 : i32
    return %c0_i32, %c0_i32_0 : i32, i32
  }
  func.func @transform_2(%arg0: i32, %arg1: memref<8xi32, #tpu.memory_space<smem>>) -> (i32, i32) {
    %c0_i32 = arith.constant 0 : i32
    %c0_i32_0 = arith.constant 0 : i32
    %c0_i32_1 = arith.constant 0 : i32
    return %c0_i32, %c0_i32_0 : i32, i32
  }
  func.func @transform_3(%arg0: i32, %arg1: memref<8xi32, #tpu.memory_space<smem>>) -> (i32, i32) {
    %c0_i32 = arith.constant 0 : i32
    %c0_i32_0 = arith.constant 0 : i32
    %c0_i32_1 = arith.constant 0 : i32
    return %c0_i32, %c0_i32_0 : i32, i32
  }
  func.func @transform_4(%arg0: i32, %arg1: memref<8xi32, #tpu.memory_space<smem>>) -> (i32, i32) {
    %c0_i32 = arith.constant 0 : i32
    %c0_i32_0 = arith.constant 0 : i32
    %c0_i32_1 = arith.constant 0 : i32
    return %c0_i32, %c0_i32_0 : i32, i32
  }
  func.func @transform_5(%arg0: i32, %arg1: memref<8xi32, #tpu.memory_space<smem>>) -> (i32, i32) {
    %c0_i32 = arith.constant 0 : i32
    %c0_i32_0 = arith.constant 0 : i32
    %c0_i32_1 = arith.constant 0 : i32
    return %c0_i32, %c0_i32_0 : i32, i32
  }
  func.func @transform_6(%arg0: i32, %arg1: memref<8xi32, #tpu.memory_space<smem>>) -> (i32, i32) {
    %c0_i32 = arith.constant 0 : i32
    %c0_i32_0 = arith.constant 0 : i32
    %c0_i32_1 = arith.constant 0 : i32
    return %c0_i32, %c0_i32_0 : i32, i32
  }
  func.func @transform_7(%arg0: i32, %arg1: memref<8xi32, #tpu.memory_space<smem>>) -> (i32, i32) {
    %c0_i32 = arith.constant 0 : i32
    %c0_i32_0 = arith.constant 0 : i32
    %c0_i32_1 = arith.constant 0 : i32
    return %c0_i32, %c0_i32_0 : i32, i32
  }
  func.func @transform_8(%arg0: i32, %arg1: memref<8xi32, #tpu.memory_space<smem>>) -> (i32, i32) {
    %c0_i32 = arith.constant 0 : i32
    %c0_i32_0 = arith.constant 0 : i32
    %c0_i32_1 = arith.constant 0 : i32
    return %c0_i32, %c0_i32_0 : i32, i32
  }
}

</mosaic_0001>

<bundles_post_ra>
// kernel: tpu_custom_call.1
= control target key start
LH: loop header
LB: loop body
LE: loop exit
PB: predicated region body
PF: predicated region fallthrough
CT: control target
= control target key end

     0   :  { %s3143_s0 = inlined_call_operand.vmem [shape: s32[8], index: 0, kind: input, shape index: {}]   ;;  %s3144_s1 = inlined_call_operand.vmem [shape: f32[2,1024], index: 1, kind: input, shape index: {}]   ;;  %s3145_s2 = inlined_call_operand.vmem [shape: f32[104,32], index: 2, kind: input, shape index: {}]   ;;  %s3146_s3 = inlined_call_operand.vmem [shape: bf16[1024,64], index: 3, kind: input, shape index: {}]   ;;  %s3147_s4 = inlined_call_operand.vmem [shape: bf16[64,512], index: 4, kind: input, shape index: {}]   ;;  %s3148_s5 = inlined_call_operand.vmem [shape: bf16[32,256], index: 5, kind: input, shape index: {}]   ;;  %s3149_s6 = inlined_call_operand.vmem [shape: bf16[512,256], index: 6, kind: input, shape index: {}]   ;;  %s3150_s7 = inlined_call_operand.vmem [shape: bf16[256,128], index: 7, kind: input, shape index: {}]   ;;  %s3151_s8 = inlined_call_operand.vmem [shape: f32[8,512], index: 8, kind: input, shape index: {}]   ;;  %s3152_s9 = inlined_call_operand.hbm [shape: f32[16,128], index: 9, kind: output, shape index: {}]  }
   0x1   :  { %s14_s11 = sshll.u32 %s3143_s0, 4  ;;  %s15_s11 = int_to_ptr.vmem [resolvable:$true] %s14_s11 }
   0x2   :  { %s2442_s12 = scalar_lea.vmem %s15_s11, 16  ;;  %p2447_p1 = scmp.lt.s32.totalorder %s15_s11, %s15_s11 }
   0x3   :  { %p2443_p0 = scmp.ne.s32.totalorder %s15_s11, %s2442_s12  ;;  %p2448_p2 = scmp.lt.s32.totalorder %s2442_s12, %s2442_s12 }
   0x5   :  { %p2449_p3 = por %p2448_p2, %p2447_p1 }
   0x7   :  { %p2450_p4 = pnand %p2449_p3, %p2443_p0 }
   0x9   :  { %2453 = shalt.err (!%p2450_p4)  }
   0xa   :  { %s2478_s13 = smov [#allocation3]  }
   0xb   :  { %17 = dma.vmem_to_smem %s15_s11, 16, %s2478_s13, [#allocation2] }
   0xc   :  { %2474 = dma.done.wait [#allocation2], 16 }
   0xd   :  { %2475 = vsyncadd [#allocation2], 4294967280 }
   0xe   :  { %19 = sfence }
   0xf   :  { %v2218_v0 = vld [vmem:[%s3146_s3 + $0x78] sm:$0xff]   ;;  %v2222_v4 = vld [vmem:[%s3146_s3 + $0x70] sm:$0xff]   ;;  %v2226_v8 = vld [vmem:[%s3146_s3 + $0x68] sm:$0xff]   ;;  %v109_v28 = vlaneseq  ;;  %v2479_v36 = vmov 1983009808  }
  0x10   :  { %v2219_v1 = vld [vmem:[%s3146_s3 + $0xf8] sm:$0xff]   ;;  %2101 = vmatprep.subr.bf16.mxu0 %v2218_v0  ;;  %v2223_v5 = vld [vmem:[%s3146_s3 + $0xf0] sm:$0xff]   ;;  %v2227_v9 = vld [vmem:[%s3146_s3 + $0xe8] sm:$0xff]   ;;  %v107_v37 = vunpack.c.l.s4 %v2479_v36 }
  0x11   :  { %v2220_v2 = vld [vmem:[%s3146_s3 + $0x38] sm:$0xff]   ;;  %2123 = vmatprep.subr.bf16.mxu1 %v2219_v1  ;;  %v2224_v6 = vld [vmem:[%s3146_s3 + $0x30] sm:$0xff]   ;;  %v2228_v10 = vld [vmem:[%s3146_s3 + $0x28] sm:$0xff]   ;;  %v2634_v33 = vshrl.u32 %v109_v28, 7 }
  0x12   :  { %v2221_v3 = vld [vmem:[%s3146_s3 + $0xb8] sm:$0xff]   ;;  %2102 = vmatpush3.bf16.msra.mxu0 %v2220_v2  ;;  %v2225_v7 = vld [vmem:[%s3146_s3 + $0xb0] sm:$0xff]   ;;  %v2229_v11 = vld [vmem:[%s3146_s3 + $0xa8] sm:$0xff]   ;;  %v108_v39 = vunpack.c.0.s8 %v107_v37 }
  0x13   :  { %2124 = vmatpush3.bf16.msra.mxu1 %v2221_v3  ;;  %2103 = vmatprep.subr.bf16.mxu0 %v2222_v4  ;;  %v2230_v12 = vld [vmem:[%s3146_s3 + $0x60] sm:$0xff]   ;;  %v2234_v16 = vld [vmem:[%s3146_s3 + $0x58] sm:$0xff]   ;;  %v2238_v20 = vld [vmem:[%s3146_s3 + $0x50] sm:$0xff]  }
  0x14   :  { %2125 = vmatprep.subr.bf16.mxu1 %v2223_v5  ;;  %v2231_v13 = vld [vmem:[%s3146_s3 + $0xe0] sm:$0xff]   ;;  %v2235_v17 = vld [vmem:[%s3146_s3 + $0xd8] sm:$0xff]   ;;  %v2239_v21 = vld [vmem:[%s3146_s3 + $0xd0] sm:$0xff]   ;;  %v2646_v41 = vsub.s32 %v108_v39, %v2634_v33 }
  0x15   :  { %v2232_v14 = vld [vmem:[%s3146_s3 + $0x20] sm:$0xff]   ;;  %v2236_v18 = vld [vmem:[%s3146_s3 + $0x18] sm:$0xff]   ;;  %v2240_v22 = vld [vmem:[%s3146_s3 + $0x10] sm:$0xff]  }
  0x16   :  { %2104 = vmatpush3.bf16.msra.mxu0 %v2224_v6  ;;  %v2233_v15 = vld [vmem:[%s3146_s3 + $0xa0] sm:$0xff]   ;;  %v2237_v19 = vld [vmem:[%s3146_s3 + $0x98] sm:$0xff]   ;;  %v2241_v23 = vld [vmem:[%s3146_s3 + $0x90] sm:$0xff]  }
  0x17   :  { %2126 = vmatpush3.bf16.msra.mxu1 %v2225_v7  ;;  %2105 = vmatprep.subr.bf16.mxu0 %v2226_v8  ;;  %v2242_v24 = vld [vmem:[%s3146_s3 + $0x48] sm:$0xff]   ;;  %v2246_v29 = vld [vmem:[%s3146_s3 + $0x40] sm:$0xff]   ;;  %v2251_v35 = vld [vmem:[%s3146_s3 + $0x178] sm:$0xff]  }
  0x18   :  { %2127 = vmatprep.subr.bf16.mxu1 %v2227_v9  ;;  %v2243_v25 = vld [vmem:[%s3146_s3 + $0xc8] sm:$0xff]   ;;  %v2247_v30 = vld [vmem:[%s3146_s3 + $0xc0] sm:$0xff]   ;;  %v2252_v38 = vld [vmem:[%s3146_s3 + $0x1f8] sm:$0xff]  }
  0x19   :  { %v2244_v26 = vld [vmem:[%s3146_s3 + $0x8] sm:$0xff]   ;;  %v2248_v31 = vld [vmem:[%s3146_s3] sm:$0xff]   ;;  %v2253_v46 = vld [vmem:[%s3146_s3 + $0x138] sm:$0xff]  }
  0x1a   :  { %2106 = vmatpush3.bf16.msra.mxu0 %v2228_v10  ;;  %v2245_v27 = vld [vmem:[%s3146_s3 + $0x88] sm:$0xff]   ;;  %v2249_v32 = vld [vmem:[%s3146_s3 + $0x80] sm:$0xff]   ;;  %v2254_v49 = vld [vmem:[%s3146_s3 + $0x1b8] sm:$0xff]  }
  0x1b   :  { %2128 = vmatpush3.bf16.msra.mxu1 %v2229_v11  ;;  %2107 = vmatprep.subr.bf16.mxu0 %v2230_v12  ;;  %v101_v34 = vld [vmem:[%s3144_s1] sm:$0xff]  ;;  %v2255_v52 = vld [vmem:[%s3146_s3 + $0x170] sm:$0xff]   ;;  %v2259_v56 = vld [vmem:[%s3146_s3 + $0x168] sm:$0xff]  }
  0x1c   :  { %2129 = vmatprep.subr.bf16.mxu1 %v2231_v13  ;;  %v105_v40 = vcombine.high %v101_v34, %v101_v34  ;;  %v112_v42 = vrot.slane %v101_v34, %v2646_v41  ;;  %v2256_v53 = vld [vmem:[%s3146_s3 + $0x1f0] sm:$0xff]   ;;  %v2260_v57 = vld [vmem:[%s3146_s3 + $0x1e8] sm:$0xff]   ;;  %v2263_v60 = vld [vmem:[%s3146_s3 + $0x160] sm:$0xff]  }
  0x1d   :  { %v2257_v54 = vld [vmem:[%s3146_s3 + $0x130] sm:$0xff]   ;;  %v2261_v58 = vld [vmem:[%s3146_s3 + $0x128] sm:$0xff]   ;;  %v2264_v61 = vld [vmem:[%s3146_s3 + $0x1e0] sm:$0xff]  }
  0x1e   :  { %2108 = vmatpush3.bf16.msra.mxu0 %v2232_v14  ;;  %v119_v43 = vrot.slane %v105_v40, %v2646_v41  ;;  %v120_v44 = vcombine.high %v112_v42, %v112_v42  ;;  %v147_v47 = vpack.c.bf16 %v112_v42, %v112_v42  ;;  %v2258_v55 = vld [vmem:[%s3146_s3 + $0x1b0] sm:$0xff]   ;;  %v2262_v59 = vld [vmem:[%s3146_s3 + $0x1a8] sm:$0xff]   ;;  %v2265_v62 = vld [vmem:[%s3146_s3 + $0x120] sm:$0xff]  }
  0x1f   :  { %2130 = vmatpush3.bf16.msra.mxu1 %v2233_v15  ;;  %2109 = vmatprep.subr.bf16.mxu0 %v2234_v16  ;;  %v2266_v63 = vld [vmem:[%s3146_s3 + $0x1a0] sm:$0xff]   ;;  %v2267_v0 = vld [vmem:[%s3146_s3 + $0x158] sm:$0xff]   ;;  %v2271_v4 = vld [vmem:[%s3146_s3 + $0x150] sm:$0xff]  }
  0x20   :  { %2131 = vmatprep.subr.bf16.mxu1 %v2235_v17  ;;  %v121_v45 = vcombine.high %v119_v43, %v119_v43  ;;  %v149_v48 = vpack.c.bf16 %v119_v43, %v119_v43  ;;  %v148_v50 = vpack.c.bf16 %v120_v44, %v120_v44  ;;  %v2268_v1 = vld [vmem:[%s3146_s3 + $0x1d8] sm:$0xff]   ;;  %v2272_v5 = vld [vmem:[%s3146_s3 + $0x1d0] sm:$0xff]   ;;  %v2275_v8 = vld [vmem:[%s3146_s3 + $0x148] sm:$0xff]  }
  0x21   :  { %v2269_v2 = vld [vmem:[%s3146_s3 + $0x118] sm:$0xff]   ;;  %v2273_v6 = vld [vmem:[%s3146_s3 + $0x110] sm:$0xff]   ;;  %v2276_v9 = vld [vmem:[%s3146_s3 + $0x1c8] sm:$0xff]  }
  0x22   :  { %2110 = vmatpush3.bf16.msra.mxu0 %v2236_v18  ;;  %v150_v51 = vpack.c.bf16 %v121_v45, %v121_v45  ;;  %699 = vmatprep.mubr.bf16.mxu0 %v148_v50  ;;  %v2270_v3 = vld [vmem:[%s3146_s3 + $0x198] sm:$0xff]   ;;  %v2274_v7 = vld [vmem:[%s3146_s3 + $0x190] sm:$0xff]   ;;  %v102_v10 = vld [vmem:[%s3144_s1 + $0x8] sm:$0xff] }
  0x23   :  { %2132 = vmatpush3.bf16.msra.mxu1 %v2237_v19  ;;  %2111 = vmatprep.subr.bf16.mxu0 %v2238_v20  ;;  %v2277_v11 = vld [vmem:[%s3146_s3 + $0x108] sm:$0xff]   ;;  %v129_v13 = vrot.slane %v102_v10, %v2646_v41  ;;  %v122_v14 = vcombine.high %v102_v10, %v102_v10  ;;  %v2279_v15 = vld [vmem:[%s3146_s3 + $0x140] sm:$0xff]  }
  0x24   :  { %2133 = vmatprep.subr.bf16.mxu1 %v2239_v21  ;;  %739 = vmatprep.mubr.bf16.mxu1 %v150_v51  ;;  %v2278_v12 = vld [vmem:[%s3146_s3 + $0x188] sm:$0xff]   ;;  %v2280_v16 = vld [vmem:[%s3146_s3 + $0x1c0] sm:$0xff]  }
  0x25   :  { %v137_v17 = vcombine.high %v129_v13, %v129_v13  ;;  %v136_v18 = vrot.slane %v122_v14, %v2646_v41  ;;  %v2281_v19 = vld [vmem:[%s3146_s3 + $0x100] sm:$0xff]  }
  0x26   :  { %2112 = vmatpush3.bf16.msra.mxu0 %v2240_v22  ;;  %v2282_v20 = vld [vmem:[%s3146_s3 + $0x180] sm:$0xff]  }
  0x27   :  { %2134 = vmatpush3.bf16.msra.mxu1 %v2241_v23  ;;  %2113 = vmatprep.subr.bf16.mxu0 %v2242_v24  ;;  %v152_v21 = vpack.c.bf16 %v137_v17, %v137_v17  ;;  %v138_v22 = vcombine.high %v136_v18, %v136_v18  ;;  %v151_v24 = vpack.c.bf16 %v129_v13, %v129_v13 }
  0x28   :  { %2135 = vmatprep.subr.bf16.mxu1 %v2243_v25  ;;  %v153_v25 = vpack.c.bf16 %v136_v18, %v136_v18 }
  0x29   :  { %v154_v23 = vpack.c.bf16 %v138_v22, %v138_v22 }
  0x2a   :  { %2114 = vmatpush3.bf16.msra.mxu0 %v2244_v26 }
  0x2b   :  { %2136 = vmatpush3.bf16.msra.mxu1 %v2245_v27  ;;  %2115 = vmatprep.subr.bf16.mxu0 %v2246_v29 }
  0x2c   :  { %2137 = vmatprep.subr.bf16.mxu1 %v2247_v30 }
  0x2e   :  { %2116 = vmatpush3.bf16.msra.mxu0 %v2248_v31 }
  0x2f   :  { %2138 = vmatpush3.bf16.msra.mxu1 %v2249_v32  ;;  %2145 = vmatprep.subr.bf16.mxu0 %v2251_v35 }
  0x30   :  { %2167 = vmatprep.subr.bf16.mxu1 %v2252_v38 }
  0x31   :  { %700 = vmatmul.mubr.bf16.vlgmr.msra.gmra.mxu0 %v147_v47 }
  0x32   :  { %740 = vmatmul.mubr.bf16.vlgmr.msra.gmra.mxu1 %v149_v48  ;;  %2146 = vmatpush3.bf16.msra.mxu0 %v2253_v46 }
  0x33   :  { %2168 = vmatpush3.bf16.msra.mxu1 %v2254_v49  ;;  %2147 = vmatprep.subr.bf16.mxu0 %v2255_v52 }
  0x34   :  { %2169 = vmatprep.subr.bf16.mxu1 %v2256_v53  ;;  %779 = vmatprep.mubr.bf16.mxu0 %v152_v21 }
  0x35   :  { %819 = vmatprep.mubr.bf16.mxu1 %v154_v23 }
  0x36   :  { %2148 = vmatpush3.bf16.msra.mxu0 %v2257_v54 }
  0x37   :  { %2170 = vmatpush3.bf16.msra.mxu1 %v2258_v55  ;;  %2149 = vmatprep.subr.bf16.mxu0 %v2259_v56 }
  0x38   :  { %2171 = vmatprep.subr.bf16.mxu1 %v2260_v57 }
  0x3a   :  { %2150 = vmatpush3.bf16.msra.mxu0 %v2261_v58 }
  0x3b   :  { %2172 = vmatpush3.bf16.msra.mxu1 %v2262_v59  ;;  %2151 = vmatprep.subr.bf16.mxu0 %v2263_v60 }
  0x3c   :  { %2173 = vmatprep.subr.bf16.mxu1 %v2264_v61 }
  0x3e   :  { %2152 = vmatpush3.bf16.msra.mxu0 %v2265_v62 }
  0x3f   :  { %2174 = vmatpush3.bf16.msra.mxu1 %v2266_v63  ;;  %2153 = vmatprep.subr.bf16.mxu0 %v2267_v0 }
  0x40   :  { %2175 = vmatprep.subr.bf16.mxu1 %v2268_v1 }
  0x42   :  { %2154 = vmatpush3.bf16.msra.mxu0 %v2269_v2 }
  0x43   :  { %2176 = vmatpush3.bf16.msra.mxu1 %v2270_v3  ;;  %2155 = vmatprep.subr.bf16.mxu0 %v2271_v4 }
  0x44   :  { %2177 = vmatprep.subr.bf16.mxu1 %v2272_v5 }
  0x46   :  { %2156 = vmatpush3.bf16.msra.mxu0 %v2273_v6 }
  0x47   :  { %2178 = vmatpush3.bf16.msra.mxu1 %v2274_v7  ;;  %2157 = vmatprep.subr.bf16.mxu0 %v2275_v8 }
  0x48   :  { %2179 = vmatprep.subr.bf16.mxu1 %v2276_v9 }
  0x4a   :  { %2158 = vmatpush3.bf16.msra.mxu0 %v2277_v11 }
  0x4b   :  { %2180 = vmatpush3.bf16.msra.mxu1 %v2278_v12  ;;  %2159 = vmatprep.subr.bf16.mxu0 %v2279_v15 }
  0x4c   :  { %2181 = vmatprep.subr.bf16.mxu1 %v2280_v16 }
  0x4e   :  { %2160 = vmatpush3.bf16.msra.mxu0 %v2281_v19 }
  0x4f   :  { %2182 = vmatpush3.bf16.msra.mxu1 %v2282_v20 }
  0x51   :  { %780 = vmatmul.mubr.bf16.vlgmr.msra.gmra.mxu0 %v151_v24 }
  0x52   :  { %820 = vmatmul.mubr.bf16.vlgmr.msra.gmra.mxu1 %v153_v25 }
  0x53   :  { %20 = vsyncpa [#allocation5], 0  ;;  %v2284_v26 = vld [vmem:[%s3147_s4 + $0x60] ss:$16 sps:$4 sm:$0xff]   ;;  %v2286_v27 = vld [vmem:[%s3147_s4 + $0x64] ss:$16 sps:$4 sm:$0xff]  }
  0x54   :  { %v2289_v28 = vld [vmem:[%s3147_s4 + $0x44] ss:$16 sps:$4 sm:$0xff]   ;;  %952 = vmatprep.subr.bf16.mxu0 %v2286_v27  ;;  %v2287_v29 = vld [vmem:[%s3147_s4 + $0x40] ss:$16 sps:$4 sm:$0xff]   ;;  %v2298_v35 = vld [vmem:[%s3147_s4 + $0x6c] ss:$16 sps:$4 sm:$0xff]  }
  0x55   :  { %953 = vmatpush1.bf16.msra.mxu0 %v2284_v26  ;;  %v2292_v30 = vld [vmem:[%s3147_s4 + $0x24] ss:$16 sps:$4 sm:$0xff]   ;;  %v2290_v31 = vld [vmem:[%s3147_s4 + $0x20] ss:$16 sps:$4 sm:$0xff]   ;;  %v2480_v36 = vmov 0   ;;  %s42_s29 = sld [smem:[#allocation3]] }
  0x56   :  { %954 = vmatprep.subr.bf16.mxu0 %v2289_v28  ;;  %v2295_v32 = vld [vmem:[%s3147_s4 + $0x4] ss:$16 sps:$4 sm:$0xff]   ;;  %v2293_v34 = vld [vmem:[%s3147_s4] ss:$16 sps:$4 sm:$0xff]   ;;  %976 = vmatprep.mubr.bf16.mxu0 %v2480_v36  ;;  %s1927_s30 = sld [smem:[#allocation3 + $0x1]]  ;;  %vm87_vm0 = vcmask 1040384  }
  0x57   :  { %s1928_s1 = sld [smem:[#allocation3 + $0x2]]  ;;  %vm89_vm1 = vcmask 1041408   ;;  %vm91_vm2 = vcmask 1042432   ;;  %vm93_vm3 = vcmask 1043456   ;;  %vm95_vm4 = vcmask 1044480  }
  0x58   :  { %s1929_s10 = sld [smem:[#allocation3 + $0x3]]  ;;  %vm97_vm5 = vcmask 1045504   ;;  %vm99_vm6 = vcmask 1046528   ;;  %vm1046_vm7 = vcmask 261120   ;;  %v2296_v20 = vld [vmem:[%s3147_s4 + $0x68] ss:$16 sps:$4 sm:$0xff]  }
  0x59   :  { %955 = vmatpush1.bf16.msra.mxu0 %v2287_v29  ;;  %s1930_s11 = sld [smem:[#allocation3 + $0x4]]  ;;  %vm940_vm8 = vcmask 523264   ;;  %v2301_v22 = vld [vmem:[%s3147_s4 + $0x4c] ss:$16 sps:$4 sm:$0xff]   ;;  %v2299_v23 = vld [vmem:[%s3147_s4 + $0x48] ss:$16 sps:$4 sm:$0xff]  }
  0x5a   :  { %956 = vmatprep.subr.bf16.mxu0 %v2292_v30  ;;  %s1931_s12 = sld [smem:[#allocation3 + $0x5]]  ;;  %v2304_v24 = vld [vmem:[%s3147_s4 + $0x2c] ss:$16 sps:$4 sm:$0xff]   ;;  %v2302_v25 = vld [vmem:[%s3147_s4 + $0x28] ss:$16 sps:$4 sm:$0xff]  }
  0x5b   :  { %s43_s3 = scalar_lea.vmem %s3145_s2, %s42_s29  ;;  %s1932_s15 = sld [smem:[#allocation3 + $0x6]]  ;;  %v2307_v26 = vld [vmem:[%s3147_s4 + $0xc] ss:$16 sps:$4 sm:$0xff]   ;;  %v2305_v27 = vld [vmem:[%s3147_s4 + $0x8] ss:$16 sps:$4 sm:$0xff]  }
  0x5c   :  { %s46_s0 = scalar_lea.vmem %s3145_s2, %s1927_s30  ;;  %s1933_s18 = sld [smem:[#allocation3 + $0x7]]  ;;  %v44_v37 = vld [vmem:[%s43_s3] sm:$0x1]  ;;  %v2308_v29 = vld [vmem:[%s3148_s5 + $0x10] ss:$8 sps:$4 sm:$0xff]  }
  0x5d   :  { %957 = vmatpush1.bf16.msra.mxu0 %v2290_v31  ;;  %v47_v38 = vld [vmem:[%s46_s0] sm:$0x1]  ;;  %s49_s21 = scalar_lea.vmem %s3145_s2, %s1928_s1  ;;  %v2310_v30 = vld [vmem:[%s3148_s5 + $0x14] ss:$8 sps:$4 sm:$0xff]  }
  0x5e   :  { %958 = vmatprep.subr.bf16.mxu0 %v2295_v32  ;;  %v50_v39 = vld [vmem:[%s49_s21] sm:$0x1]  ;;  %s52_s24 = scalar_lea.vmem %s3145_s2, %s1929_s10  ;;  %v67_v40 = vrot.slane %v47_v38, 7  ;;  %v2313_v32 = vld [vmem:[%s3148_s5 + $0x4] ss:$8 sps:$4 sm:$0xff]  }
  0x5f   :  { %v53_v41 = vld [vmem:[%s52_s24] sm:$0x1]  ;;  %s55_s27 = scalar_lea.vmem %s3145_s2, %s1930_s11  ;;  %v70_v42 = vrot.slane %v50_v39, 6  ;;  %v2319_v38 = vld [vmem:[%s3149_s6 + $0x174] ss:$8 sps:$4 sm:$0xff]  }
  0x60   :  { %v56_v43 = vld [vmem:[%s55_s27] sm:$0x1]  ;;  %s58_s30 = scalar_lea.vmem %s3145_s2, %s1931_s12  ;;  %v73_v44 = vrot.slane %v53_v41, 5  ;;  %v88_v45 = vsel %vm87_vm0, %v44_v37, %v67_v40  ;;  %v2322_v37 = vld [vmem:[%s3149_s6 + $0x64] ss:$8 sps:$4 sm:$0xff]  }
  0x61   :  { %959 = vmatpush1.bf16.msra.mxu0 %v2293_v34  ;;  %v59_v46 = vld [vmem:[%s58_s30] sm:$0x1]  ;;  %s61_s13 = scalar_lea.vmem %s3145_s2, %s1932_s15  ;;  %v76_v47 = vrot.slane %v56_v43, 4  ;;  %v90_v48 = vsel %vm89_vm1, %v88_v45, %v70_v42  ;;  %v2314_v34 = vld [vmem:[%s3149_s6 + $0x70] ss:$8 sps:$4 sm:$0xff]  }
  0x62   :  { %993 = vmatprep.subr.bf16.mxu0 %v2298_v35  ;;  %v62_v49 = vld [vmem:[%s61_s13] sm:$0x1]  ;;  %s64_s3 = scalar_lea.vmem %s3145_s2, %s1933_s18  ;;  %v79_v50 = vrot.slane %v59_v46, 3  ;;  %v92_v51 = vsel %vm91_vm2, %v90_v48, %v73_v44  ;;  %v2316_v35 = vld [vmem:[%s3149_s6 + $0x74] ss:$8 sps:$4 sm:$0xff]  }
  0x63   :  { %v65_v52 = vld [vmem:[%s64_s3] sm:$0x1]  ;;  %v82_v53 = vrot.slane %v62_v49, 2  ;;  %v94_v54 = vsel %vm93_vm3, %v92_v51, %v76_v47  ;;  %1518 = vmatprep.subr.bf16.mxu1 %v2316_v35  ;;  %v2328_v40 = vld [vmem:[%s3149_s6 + $0x54] ss:$8 sps:$4 sm:$0xff]  }
  0x64   :  { %v85_v55 = vrot.slane %v65_v52, 1  ;;  %v96_v56 = vsel %vm95_vm4, %v94_v54, %v79_v50  ;;  %1519 = vmatpush1.bf16.msra.mxu1 %v2314_v34  ;;  %v2320_v39 = vld [vmem:[%s3149_s6 + $0x60] ss:$8 sps:$4 sm:$0xff]   ;;  %v2326_v41 = vld [vmem:[%s3149_s6 + $0x50] ss:$8 sps:$4 sm:$0xff]  }
  0x65   :  { %v98_v57 = vsel %vm97_vm5, %v96_v56, %v82_v53  ;;  %1520 = vmatprep.subr.bf16.mxu1 %v2322_v37  ;;  %v2334_v42 = vld [vmem:[%s3149_s6 + $0x44] ss:$8 sps:$4 sm:$0xff]   ;;  %v2332_v43 = vld [vmem:[%s3149_s6 + $0x40] ss:$8 sps:$4 sm:$0xff]   ;;  %v2340_v44 = vld [vmem:[%s3149_s6 + $0x34] ss:$8 sps:$4 sm:$0xff]  }
  0x66   :  { %v2798_v58 = vsel %vm99_vm6, %v98_v57, %v85_v55  ;;  %v2338_v47 = vld [vmem:[%s3149_s6 + $0x30] ss:$8 sps:$4 sm:$0xff]   ;;  %v2346_v49 = vld [vmem:[%s3149_s6 + $0x24] ss:$8 sps:$4 sm:$0xff]   ;;  %v2344_v52 = vld [vmem:[%s3149_s6 + $0x20] ss:$8 sps:$4 sm:$0xff]  }
  0x67   :  { %v1045_v59 = vmul.f32 %v2798_v58, %v2798_v58  ;;  %v2317_v48 = vld [vmem:[%s3149_s6 + $0x170] ss:$8 sps:$4 sm:$0xff]   ;;  %v2325_v51 = vld [vmem:[%s3149_s6 + $0x164] ss:$8 sps:$4 sm:$0xff]   ;;  %v2323_v53 = vld [vmem:[%s3149_s6 + $0x160] ss:$8 sps:$4 sm:$0xff]  }
  0x68   :  { %1521 = vmatpush1.bf16.msra.mxu1 %v2320_v39  ;;  %v2352_v54 = vld [vmem:[%s3149_s6 + $0x14] ss:$8 sps:$4 sm:$0xff]   ;;  %v2350_v56 = vld [vmem:[%s3149_s6 + $0x10] ss:$8 sps:$4 sm:$0xff]  }
  0x69   :  { %v1047_v60 = vsel %vm1046_vm7, %v1045_v59, 0.0  ;;  %1522 = vmatprep.subr.bf16.mxu1 %v2328_v40  ;;  %v2331_v55 = vld [vmem:[%s3149_s6 + $0x154] ss:$8 sps:$4 sm:$0xff]   ;;  %v2329_v57 = vld [vmem:[%s3149_s6 + $0x150] ss:$8 sps:$4 sm:$0xff]  }
  0x6a   :  { %1048 = vadd.xlane.f32.xlu0 %v1047_v60  ;;  %v2337_v59 = vld [vmem:[%s3149_s6 + $0x144] ss:$8 sps:$4 sm:$0xff]   ;;  %v2356_v60 = vld [vmem:[%s3149_s6] ss:$8 sps:$4 sm:$0xff]  }
  0x6c   :  { %1523 = vmatpush1.bf16.msra.mxu1 %v2326_v41 }
  0x6d   :  { %1524 = vmatprep.subr.bf16.mxu1 %v2334_v42 }
  0x70   :  { %1525 = vmatpush1.bf16.msra.mxu1 %v2332_v43 }
  0x71   :  { %1526 = vmatprep.subr.bf16.mxu1 %v2340_v44 }
  0x74   :  { %1527 = vmatpush1.bf16.msra.mxu1 %v2338_v47 }
  0x75   :  { %1528 = vmatprep.subr.bf16.mxu1 %v2346_v49 }
  0x78   :  { %1529 = vmatpush1.bf16.msra.mxu1 %v2344_v52  ;;  %v2385_v52 = vld [vmem:[%s3149_s6 + $0x1c4] ss:$8 sps:$4 sm:$0xff]  }
  0x79   :  { %1530 = vmatprep.subr.bf16.mxu1 %v2352_v54  ;;  %v2383_v54 = vld [vmem:[%s3149_s6 + $0x1c0] ss:$8 sps:$4 sm:$0xff]  }
  0x7c   :  { %1531 = vmatpush1.bf16.msra.mxu1 %v2350_v56  ;;  %v2388_v56 = vld [vmem:[%s3149_s6 + $0xb4] ss:$8 sps:$4 sm:$0xff]  }
  0xf1   :  { %v2117_v61 = vpop.f32.mrf.mxu0 }
  0xf2   :  { %v2139_v62 = vpop.f32.mrf.mxu1 }
  0xf3   :  { %v2118_v63 = vpop.f32.mrf.mxu0  ;;  %v1049_v28 = vpop.xlane.xlu0 %1048 }
  0xf4   :  { %v2140_v0 = vpop.f32.mrf.mxu1  ;;  %v2119_v5 = vadd.f32 %v2118_v63, %v2117_v61  ;;  %v1050_v31 = vmax.f32 %v1049_v28, 1e-24  ;;  %v2335_v61 = vld [vmem:[%s3149_s6 + $0x140] ss:$8 sps:$4 sm:$0xff]   ;;  %v2343_v63 = vld [vmem:[%s3149_s6 + $0x134] ss:$8 sps:$4 sm:$0xff]  }
  0xf5   :  { %v2120_v1 = vpop.f32.mrf.mxu0  ;;  %v2141_v6 = vadd.f32 %v2140_v0, %v2139_v62  ;;  %v2364_v62 = vld [vmem:[%s3149_s6 + $0xf4] ss:$8 sps:$4 sm:$0xff]   ;;  %v2362_v0 = vld [vmem:[%s3149_s6 + $0xf0] ss:$8 sps:$4 sm:$0xff]  }
  0xf6   :  { %v2142_v2 = vpop.f32.mrf.mxu1  ;;  %2426 = vrsqrt.f32 %v1050_v31  ;;  %v2341_v1 = vld [vmem:[%s3149_s6 + $0x130] ss:$8 sps:$4 sm:$0xff]  }
  0xf7   :  { %v2121_v3 = vpop.f32.mrf.mxu0  ;;  %v742_v11 = vadd.f32 %v2141_v6, %v2119_v5  ;;  %v2370_v2 = vld [vmem:[%s3149_s6 + $0xe4] ss:$8 sps:$4 sm:$0xff]   ;;  %v2347_v5 = vld [vmem:[%s3149_s6 + $0x120] ss:$8 sps:$4 sm:$0xff]   ;;  %v2376_v6 = vld [vmem:[%s3149_s6 + $0xd4] ss:$8 sps:$4 sm:$0xff]  }
  0xf8   :  { %v2143_v4 = vpop.f32.mrf.mxu1  ;;  %v2349_v3 = vld [vmem:[%s3149_s6 + $0x124] ss:$8 sps:$4 sm:$0xff]   ;;  %v40_v28 = vld [vmem:[%s3151_s8 + $0x10] sm:$0xff] }
  0xf9   :  { %v2368_v4 = vld [vmem:[%s3149_s6 + $0xe0] ss:$8 sps:$4 sm:$0xff]  }
 0x103   :  { %v2427_v45 = vpop.eup %2426 }
 0x104   :  { %v1052_v46 = vmul.f32 %v2427_v45, %v2798_v58  ;;  %v2358_v58 = vld [vmem:[%s3149_s6 + $0x4] ss:$8 sps:$4 sm:$0xff]  }
 0x105   :  { %1532 = vmatprep.subr.bf16.mxu1 %v2358_v58  ;;  %v2391_v58 = vld [vmem:[%s3149_s6 + $0x1b4] ss:$8 sps:$4 sm:$0xff]  }
 0x106   :  { %v1053_v50 = vpack.c.bf16 %v1052_v46, %v1052_v46  ;;  %1533 = vmatpush1.bf16.msra.mxu1 %v2356_v60  ;;  %v2397_v60 = vld [vmem:[%s3149_s6 + $0x1a4] ss:$8 sps:$4 sm:$0xff]  }
 0x107   :  { %1534 = vmatprep.subr.bf16.mxu1 %v2364_v62  ;;  %v2395_v62 = vld [vmem:[%s3149_s6 + $0x1a0] ss:$8 sps:$4 sm:$0xff]  }
 0x10a   :  { %1535 = vmatpush2.bf16.msra.mxu1 %v2362_v0  ;;  %v2403_v0 = vld [vmem:[%s3149_s6 + $0x194] ss:$8 sps:$4 sm:$0xff]  }
 0x10b   :  { %1536 = vmatprep.subr.bf16.mxu1 %v2370_v2  ;;  %v2401_v2 = vld [vmem:[%s3149_s6 + $0x190] ss:$8 sps:$4 sm:$0xff]  }
 0x10e   :  { %1537 = vmatpush2.bf16.msra.mxu1 %v2368_v4  ;;  %v2409_v4 = vld [vmem:[%s3149_s6 + $0x184] ss:$8 sps:$4 sm:$0xff]  }
 0x10f   :  { %1538 = vmatprep.subr.bf16.mxu1 %v2376_v6  ;;  %v2407_v6 = vld [vmem:[%s3149_s6 + $0x180] ss:$8 sps:$4 sm:$0xff]  }
 0x111   :  { %v2161_v7 = vpop.f32.mrf.mxu0 }
 0x112   :  { %v2183_v8 = vpop.f32.mrf.mxu1 }
 0x113   :  { %v2162_v9 = vpop.f32.mrf.mxu0 }
 0x114   :  { %v2184_v10 = vpop.f32.mrf.mxu1  ;;  %v2163_v12 = vadd.f32 %v2162_v9, %v2161_v7  ;;  %v2355_v7 = vld [vmem:[%s3149_s6 + $0x114] ss:$8 sps:$4 sm:$0xff]   ;;  %v2353_v9 = vld [vmem:[%s3149_s6 + $0x110] ss:$8 sps:$4 sm:$0xff]  }
 0x115   :  { %v2164_v13 = vpop.f32.mrf.mxu0  ;;  %v2185_v16 = vadd.f32 %v2184_v10, %v2183_v8  ;;  %v2374_v8 = vld [vmem:[%s3149_s6 + $0xd0] ss:$8 sps:$4 sm:$0xff]   ;;  %v2361_v10 = vld [vmem:[%s3149_s6 + $0x104] ss:$8 sps:$4 sm:$0xff]  }
 0x116   :  { %v2186_v14 = vpop.f32.mrf.mxu1  ;;  %v782_v15 = vadd.f32 %v2163_v12, %v742_v11  ;;  %1539 = vmatpush2.bf16.msra.mxu1 %v2374_v8  ;;  %v2359_v11 = vld [vmem:[%s3149_s6 + $0x100] ss:$8 sps:$4 sm:$0xff]   ;;  %v2367_v12 = vld [vmem:[%s3149_s6 + $0x1f4] ss:$8 sps:$4 sm:$0xff]   ;;  %v2365_v13 = vld [vmem:[%s3149_s6 + $0x1f0] ss:$8 sps:$4 sm:$0xff]  }
 0x117   :  { %v2165_v17 = vpop.f32.mrf.mxu0  ;;  %v2373_v14 = vld [vmem:[%s3149_s6 + $0x1e4] ss:$8 sps:$4 sm:$0xff]  }
 0x118   :  { %v2187_v18 = vpop.f32.mrf.mxu1  ;;  %v822_v19 = vadd.f32 %v2185_v16, %v782_v15  ;;  %v2371_v15 = vld [vmem:[%s3149_s6 + $0x1e0] ss:$8 sps:$4 sm:$0xff]   ;;  %v2379_v16 = vld [vmem:[%s3149_s6 + $0x1d4] ss:$8 sps:$4 sm:$0xff]   ;;  %v2377_v17 = vld [vmem:[%s3149_s6 + $0x1d0] ss:$8 sps:$4 sm:$0xff]  }
 0x11a   :  { %v827_v21 = vpack.c.bf16 %v822_v19, %v822_v19  ;;  %v2977_v19 = vld [vmem:[%s3151_s8 + $0x8] sm:$0xff] }
 0x11c   :  { %2014 = vmatmul.mubr.msk.bf16.vlgmr.msra.gmra.mxu0 %vm940_vm8, %v827_v21 }
 0x11d   :  { %994 = vmatpush1.bf16.msra.mxu0 %v2296_v20  ;;  %1017 = vmatprep.mubr.bf16.mxu0 %v2480_v36 }
 0x11e   :  { %995 = vmatprep.subr.bf16.mxu0 %v2301_v22  ;;  %v2985_v22 = vld [vmem:[%s3151_s8] sm:$0xff] }
 0x121   :  { %996 = vmatpush1.bf16.msra.mxu0 %v2299_v23 }
 0x122   :  { %997 = vmatprep.subr.bf16.mxu0 %v2304_v24 }
 0x125   :  { %998 = vmatpush1.bf16.msra.mxu0 %v2302_v25 }
 0x126   :  { %999 = vmatprep.subr.bf16.mxu0 %v2307_v26 }
 0x129   :  { %1000 = vmatpush1.bf16.msra.mxu0 %v2305_v27 }
 0x12a   :  { %1093 = vmatprep.subr.bf16.mxu0 %v2310_v30  ;;  %v41_v30 = vld [vmem:[%s3151_s8 + $0x18] sm:$0xff] }
 0x12c   :  { %2015 = vmatmul.mubr.msk.bf16.vlgmr.msra.gmra.mxu0 %vm940_vm8, %v827_v21  ;;  %v2980_v21 = vsub.s32 0, %v2634_v33 }
 0x12d   :  { %1113 = vmatprep.mubr.bf16.mxu0 %v2480_v36  ;;  %1094 = vmatpush1.bf16.msra.mxu0 %v2308_v29  ;;  %v2311_v36 = vld [vmem:[%s3148_s5] ss:$8 sps:$4 sm:$0xff]  }
 0x12e   :  { %1095 = vmatprep.subr.bf16.mxu0 %v2313_v32  ;;  %v851_v24 = vrot.slane %v2977_v19, %v2980_v21  ;;  %v847_v26 = vrot.slane %v2985_v22, %v2980_v21  ;;  %v855_v32 = vrot.slane %v40_v28, %v2980_v21  ;;  %v859_v35 = vrot.slane %v41_v30, %v2980_v21 }
 0x12f   :  { %v2481_v28 = vmov 1966171168  }
 0x130   :  { %v1604_v30 = vunpack.c.l.s4 %v2481_v28 }
 0x131   :  { %1096 = vmatpush1.bf16.msra.mxu0 %v2311_v36 }
 0x132   :  { %1559 = vmatprep.subr.bf16.mxu0 %v2319_v38 }
 0x134   :  { %2020 = vmatmul.mubr.msk.bf16.vlgmr.msra.gmra.mxu0 %vm1046_vm7, %v1053_v50 }
 0x135   :  { %1560 = vmatpush1.bf16.msra.mxu0 %v2317_v48 }
 0x136   :  { %1561 = vmatprep.subr.bf16.mxu0 %v2325_v51  ;;  %v2382_v51 = vld [vmem:[%s3149_s6 + $0xc4] ss:$8 sps:$4 sm:$0xff]  }
 0x137   :  { %1540 = vmatprep.subr.bf16.mxu1 %v2382_v51 }
 0x139   :  { %1562 = vmatpush1.bf16.msra.mxu0 %v2323_v53  ;;  %v2380_v53 = vld [vmem:[%s3149_s6 + $0xc0] ss:$8 sps:$4 sm:$0xff]  }
 0x13a   :  { %1563 = vmatprep.subr.bf16.mxu0 %v2331_v55  ;;  %1541 = vmatpush2.bf16.msra.mxu1 %v2380_v53  ;;  %v2386_v55 = vld [vmem:[%s3149_s6 + $0xb0] ss:$8 sps:$4 sm:$0xff]  }
 0x13b   :  { %1542 = vmatprep.subr.bf16.mxu1 %v2388_v56 }
 0x13d   :  { %1564 = vmatpush1.bf16.msra.mxu0 %v2329_v57  ;;  %v2389_v57 = vld [vmem:[%s3149_s6 + $0x1b0] ss:$8 sps:$4 sm:$0xff]  }
 0x13e   :  { %1565 = vmatprep.subr.bf16.mxu0 %v2337_v59  ;;  %v2394_v59 = vld [vmem:[%s3149_s6 + $0xa4] ss:$8 sps:$4 sm:$0xff]   ;;  %1543 = vmatpush2.bf16.msra.mxu1 %v2386_v55 }
 0x13f   :  { %1544 = vmatprep.subr.bf16.mxu1 %v2394_v59 }
 0x141   :  { %1566 = vmatpush1.bf16.msra.mxu0 %v2335_v61  ;;  %v2392_v61 = vld [vmem:[%s3149_s6 + $0xa0] ss:$8 sps:$4 sm:$0xff]  }
 0x142   :  { %1567 = vmatprep.subr.bf16.mxu0 %v2343_v63  ;;  %v2400_v63 = vld [vmem:[%s3149_s6 + $0x94] ss:$8 sps:$4 sm:$0xff]   ;;  %1545 = vmatpush2.bf16.msra.mxu1 %v2392_v61 }
 0x143   :  { %1546 = vmatprep.subr.bf16.mxu1 %v2400_v63 }
 0x145   :  { %1568 = vmatpush1.bf16.msra.mxu0 %v2341_v1  ;;  %v2398_v1 = vld [vmem:[%s3149_s6 + $0x90] ss:$8 sps:$4 sm:$0xff]  }
 0x146   :  { %1569 = vmatprep.subr.bf16.mxu0 %v2349_v3  ;;  %v2406_v3 = vld [vmem:[%s3149_s6 + $0x84] ss:$8 sps:$4 sm:$0xff]   ;;  %1547 = vmatpush2.bf16.msra.mxu1 %v2398_v1 }
 0x147   :  { %1548 = vmatprep.subr.bf16.mxu1 %v2406_v3 }
 0x149   :  { %1570 = vmatpush1.bf16.msra.mxu0 %v2347_v5  ;;  %v2404_v5 = vld [vmem:[%s3149_s6 + $0x80] ss:$8 sps:$4 sm:$0xff]  }
 0x14a   :  { %1571 = vmatprep.subr.bf16.mxu0 %v2355_v7  ;;  %1549 = vmatpush2.bf16.msra.mxu1 %v2404_v5 }
 0x14d   :  { %1572 = vmatpush1.bf16.msra.mxu0 %v2353_v9 }
 0x14e   :  { %1573 = vmatprep.subr.bf16.mxu0 %v2361_v10 }
 0x151   :  { %1574 = vmatpush1.bf16.msra.mxu0 %v2359_v11 }
 0x152   :  { %1575 = vmatprep.subr.bf16.mxu0 %v2367_v12 }
 0x155   :  { %1576 = vmatpush2.bf16.msra.mxu0 %v2365_v13 }
 0x156   :  { %1577 = vmatprep.subr.bf16.mxu0 %v2373_v14 }
 0x159   :  { %1578 = vmatpush2.bf16.msra.mxu0 %v2371_v15 }
 0x15a   :  { %1579 = vmatprep.subr.bf16.mxu0 %v2379_v16 }
 0x15d   :  { %1580 = vmatpush2.bf16.msra.mxu0 %v2377_v17 }
 0x15e   :  { %1581 = vmatprep.subr.bf16.mxu0 %v2385_v52 }
 0x161   :  { %1582 = vmatpush2.bf16.msra.mxu0 %v2383_v54 }
 0x162   :  { %1583 = vmatprep.subr.bf16.mxu0 %v2391_v58 }
 0x165   :  { %1584 = vmatpush2.bf16.msra.mxu0 %v2389_v57 }
 0x166   :  { %1585 = vmatprep.subr.bf16.mxu0 %v2397_v60 }
 0x169   :  { %1586 = vmatpush2.bf16.msra.mxu0 %v2395_v62 }
 0x16a   :  { %1587 = vmatprep.subr.bf16.mxu0 %v2403_v0 }
 0x16d   :  { %1588 = vmatpush2.bf16.msra.mxu0 %v2401_v2 }
 0x16e   :  { %1589 = vmatprep.subr.bf16.mxu0 %v2409_v4 }
 0x171   :  { %1590 = vmatpush2.bf16.msra.mxu0 %v2407_v6 }
 0x1dc   :  { %v978_v18 = vpop.f32.mrf.mxu0 }
 0x1dd   :  { %v2996_v29 = vadd.f32 %v978_v18, %v847_v26 }
 0x1de   :  { %v980_v20 = vpop.f32.mrf.mxu0 }
 0x1df   :  { %v2991_v27 = vadd.f32 %v980_v20, %v851_v24  ;;  %v1026_v34 = vmul.f32 %v2996_v29, %v2996_v29 }
 0x1e0   :  { %v982_v23 = vpop.f32.mrf.mxu0 }
 0x1e1   :  { %v1027_v31 = vmul.f32 %v2991_v27, %v2991_v27  ;;  %v1030_v40 = vsel %vm89_vm1, %v1026_v34, 0.0  ;;  %v1605_v34 = vunpack.c.0.s8 %v1604_v30 }
 0x1e2   :  { %v983_v25 = vpop.f32.mrf.mxu0 }
 0x1e3   :  { %v1031_v37 = vsel %vm89_vm1, %v1027_v31, 0.0  ;;  %v1192_v25 = vsub.s32 1, %v2634_v33 }
 0x1e4   :  { %v1032_v44 = vadd.f32 %v1031_v37, %v1030_v40 }
 0x1e5   :  { %v1193_v26 = vrot.slane %v2985_v22, %v1192_v25 }
 0x1ec   :  { %v1019_v36 = vpop.f32.mrf.mxu0 }
 0x1ed   :  { %v3008_v38 = vadd.f32 %v1019_v36, %v855_v32 }
 0x1ee   :  { %v1021_v39 = vpop.f32.mrf.mxu0 }
 0x1ef   :  { %v1028_v41 = vmul.f32 %v3008_v38, %v3008_v38  ;;  %v1022_v42 = vadd.f32 %v1021_v39, %v859_v35 }
 0x1f0   :  { %v1023_v43 = vpop.f32.mrf.mxu0 }
 0x1f1   :  { %v1029_v45 = vmul.f32 %v1022_v42, %v1022_v42  ;;  %v1033_v46 = vsel %vm89_vm1, %v1028_v41, 0.0 }
 0x1f2   :  { %v1024_v47 = vpop.f32.mrf.mxu0  ;;  %v1034_v48 = vadd.f32 %v1033_v46, %v1032_v44 }
 0x1f3   :  { %v1035_v49 = vsel %vm89_vm1, %v1029_v45, 0.0 }
 0x1f4   :  { %v1036_v50 = vadd.f32 %v1035_v49, %v1034_v48  ;;  %v1115_v7 = vpop.f32.mrf.mxu0 }
 0x1f6   :  { %1037 = vadd.xlane.f32.xlu0 %v1036_v50  ;;  %v1117_v8 = vpop.f32.mrf.mxu0 }
 0x1f8   :  { %v1119_v9 = vpop.f32.mrf.mxu0 }
 0x1fa   :  { %v1120_v10 = vpop.f32.mrf.mxu0 }
 0x27f   :  { %v1038_v11 = vpop.xlane.xlu0 %1037 }
 0x280   :  { %v1039_v12 = vmax.f32 %v1038_v11, 1e-24 }
 0x282   :  { %2428 = vrsqrt.f32 %v1039_v12 }
 0x28f   :  { %v2429_v13 = vpop.eup %2428 }
 0x290   :  { %v1042_v14 = vmul.f32 %v2429_v13, %v2991_v27  ;;  %v1044_v15 = vmul.f32 %v2429_v13, %v1022_v42  ;;  %v1041_v16 = vmul.f32 %v2429_v13, %v2996_v29  ;;  %v1043_v17 = vmul.f32 %v2429_v13, %v3008_v38 }
 0x291   :  { %v1197_v27 = vrot.slane %v2977_v19, %v1192_v25  ;;  %v1608_v42 = vsub.s32 %v1605_v34, %v2634_v33  ;;  %v2411_v34 = vld [vmem:[%s3150_s7 + $0x38] sm:$0xff]  }
 0x292   :  { %v1123_v18 = vpack.c.bf16 %v1042_v14, %v1042_v14  ;;  %v1125_v20 = vpack.c.bf16 %v1044_v15, %v1044_v15  ;;  %v1122_v23 = vpack.c.bf16 %v1041_v16, %v1041_v16  ;;  %v1124_v24 = vpack.c.bf16 %v1043_v17, %v1043_v17  ;;  %v2410_v15 = vld [vmem:[%s3150_s7 + $0x78] sm:$0xff]  }
 0x293   :  { %2189 = vmatprep.subr.bf16.mxu1 %v2410_v15 }
 0x294   :  { %1550 = vmatprep.mubr.bf16.mxu1 %v1123_v18  ;;  %1591 = vmatprep.mubr.bf16.mxu0 %v1125_v20 }
 0x295   :  { %1551 = vmatmul.mubr.bf16.vlgmr.msra.gmra.mxu1 %v1122_v23  ;;  %1592 = vmatmul.mubr.bf16.vlgmr.msra.gmra.mxu0 %v1124_v24 }
 0x296   :  { %2190 = vmatpush3.bf16.msra.mxu1 %v2411_v34 }
 0x355   :  { %v1552_v31 = vpop.f32.mrf.mxu1  ;;  %v1593_v29 = vpop.f32.mrf.mxu0 }
 0x356   :  { %v1553_v32 = vadd.f32 %v1552_v31, %v1193_v26 }
 0x357   :  { %v1554_v35 = vpop.f32.mrf.mxu1  ;;  %v1595_v36 = vpop.f32.mrf.mxu0 }
 0x358   :  { %v1555_v37 = vadd.f32 %v1554_v35, %v1197_v27  ;;  %v1594_v40 = vadd.f32 %v1593_v29, %v1553_v32  ;;  %v2412_v35 = vld [vmem:[%s3150_s7 + $0x70] sm:$0xff]  }
 0x359   :  { %v1556_v38 = vpop.f32.mrf.mxu1  ;;  %v1597_v39 = vpop.f32.mrf.mxu0  ;;  %2191 = vmatprep.subr.bf16.mxu1 %v2412_v35 }
 0x35a   :  { %v1596_v41 = vadd.f32 %v1595_v36, %v1555_v37  ;;  %v2413_v36 = vld [vmem:[%s3150_s7 + $0x30] sm:$0xff]   ;;  %v2414_v37 = vld [vmem:[%s3150_s7 + $0x68] sm:$0xff]   ;;  %v2416_v39 = vld [vmem:[%s3150_s7 + $0x60] sm:$0xff]  }
 0x35b   :  { %v1557_v43 = vpop.f32.mrf.mxu1  ;;  %v1598_v44 = vpop.f32.mrf.mxu0  ;;  %2192 = vmatpush3.bf16.msra.mxu1 %v2413_v36  ;;  %v2415_v38 = vld [vmem:[%s3150_s7 + $0x28] sm:$0xff]  }
 0x35c   :  { %v1602_v45 = vcombine.low %v1594_v40, %v1596_v41  ;;  %2193 = vmatprep.subr.bf16.mxu1 %v2414_v37  ;;  %v2417_v40 = vld [vmem:[%s3150_s7 + $0x20] sm:$0xff]   ;;  %v2418_v41 = vld [vmem:[%s3150_s7 + $0x58] sm:$0xff]   ;;  %v2420_v43 = vld [vmem:[%s3150_s7 + $0x50] sm:$0xff]  }
 0x35d   :  { %v2421_v44 = vld [vmem:[%s3150_s7 + $0x10] sm:$0xff]  }
 0x35e   :  { %v1609_v46 = vrot.slane %v1602_v45, %v1608_v42  ;;  %v2422_v45 = vld [vmem:[%s3150_s7 + $0x48] sm:$0xff]  }
 0x35f   :  { %2194 = vmatpush3.bf16.msra.mxu1 %v2415_v38 }
 0x360   :  { %v1610_v47 = vcombine.high %v1609_v46, %v1609_v46  ;;  %v1617_v48 = vrot.slane %v1609_v46, %v1608_v42  ;;  %2195 = vmatprep.subr.bf16.mxu1 %v2416_v39  ;;  %v2423_v46 = vld [vmem:[%s3150_s7 + $0x8] sm:$0xff]  }
 0x362   :  { %v1624_v49 = vrot.slane %v1610_v47, %v1608_v42  ;;  %v1628_v50 = vrot.slane %v1617_v48, %v2980_v21  ;;  %v1632_v51 = vrot.slane %v1617_v48, %v1192_v25  ;;  %v2419_v42 = vld [vmem:[%s3150_s7 + $0x18] sm:$0xff]   ;;  %v2424_v47 = vld [vmem:[%s3150_s7 + $0x40] sm:$0xff]  }
 0x363   :  { %2196 = vmatpush3.bf16.msra.mxu1 %v2417_v40  ;;  %v2425_v48 = vld [vmem:[%s3150_s7] sm:$0xff]   ;;  %s2482_s7 = smov [#allocation4]  }
 0x364   :  { %v1645_v52 = vadd.f32 %v1628_v50, %v1115_v7  ;;  %v1646_v53 = vadd.f32 %v1632_v51, %v1117_v8  ;;  %v1636_v54 = vrot.slane %v1624_v49, %v2980_v21  ;;  %v1640_v55 = vrot.slane %v1624_v49, %v1192_v25  ;;  %2197 = vmatprep.subr.bf16.mxu1 %v2418_v41  ;;  %s1908_s11 = sshll.u32 %s2482_s7, 4  ;;  %s1909_s11 = int_to_ptr.vmem [resolvable:$true] %s1908_s11 }
 0x365   :  { %s2454_s14 = scalar_lea.vmem %s1909_s11, 256  ;;  %p2459_p6 = scmp.lt.s32.totalorder %s1909_s11, %s1909_s11 }
 0x366   :  { %v1653_v56 = vmul.f32 0.70710677, %v1645_v52  ;;  %v1654_v57 = vmul.f32 0.70710677, %v1646_v53  ;;  %v1647_v58 = vadd.f32 %v1636_v54, %v1115_v7  ;;  %v1648_v59 = vadd.f32 %v1640_v55, %v1117_v8  ;;  %p2455_p5 = scmp.ne.s32.totalorder %s1909_s11, %s2454_s14  ;;  %p2460_p7 = scmp.lt.s32.totalorder %s2454_s14, %s2454_s14 }
 0x367   :  { %v1649_v0 = vmul.f32 0.5, %v1645_v52  ;;  %v1650_v2 = vmul.f32 0.5, %v1646_v53  ;;  %2198 = vmatpush3.bf16.msra.mxu1 %v2419_v42  ;;  %v1704_v55 = vsub.s32 2, %v2634_v33 }
 0x368   :  { %2430 = verf.f32 %v1653_v56  ;;  %v1655_v60 = vmul.f32 0.70710677, %v1647_v58  ;;  %v1656_v61 = vmul.f32 0.70710677, %v1648_v59  ;;  %v1651_v9 = vmul.f32 0.5, %v1647_v58  ;;  %2199 = vmatprep.subr.bf16.mxu1 %v2420_v43  ;;  %p2461_p8 = por %p2460_p7, %p2459_p6 }
 0x369   :  { %2432 = verf.f32 %v1654_v57  ;;  %v1652_v7 = vmul.f32 0.5, %v1648_v59  ;;  %v1716_v57 = vsub.s32 3, %v2634_v33  ;;  %v1709_v59 = vrot.slane %v2977_v19, %v1704_v55 }
 0x36a   :  { %2434 = verf.f32 %v1655_v60  ;;  %p2462_p9 = pnand %p2461_p8, %p2455_p5 }
 0x36b   :  { %2436 = verf.f32 %v1656_v61  ;;  %2200 = vmatpush3.bf16.msra.mxu1 %v2421_v44  ;;  %v1705_v61 = vrot.slane %v2985_v22, %v1704_v55 }
 0x36c   :  { %2201 = vmatprep.subr.bf16.mxu1 %v2422_v45 }
 0x36f   :  { %2202 = vmatpush3.bf16.msra.mxu1 %v2423_v46 }
 0x370   :  { %2203 = vmatprep.subr.bf16.mxu1 %v2424_v47 }
 0x373   :  { %2204 = vmatpush3.bf16.msra.mxu1 %v2425_v48 }
 0x375   :  { %v2431_v62 = vpop.eup %2430 }
 0x376   :  { %v2433_v63 = vpop.eup %2432  ;;  %v1661_v1 = vadd.f32 1.0, %v2431_v62 }
 0x377   :  { %v1662_v3 = vadd.f32 1.0, %v2433_v63  ;;  %v2435_v4 = vpop.eup %2434  ;;  %v1721_v63 = vrot.slane %v2977_v19, %v1716_v57 }
 0x378   :  { %v1665_v5 = vmul.f32 %v1661_v1, %v1649_v0  ;;  %v2437_v21 = vpop.eup %2436  ;;  %v1663_v10 = vadd.f32 1.0, %v2435_v4  ;;  %v1717_v0 = vrot.slane %v2985_v22, %v1716_v57 }
 0x379   :  { %v1666_v6 = vmul.f32 %v1662_v3, %v1650_v2  ;;  %v1664_v8 = vadd.f32 1.0, %v2437_v21 }
 0x37a   :  { %v1667_v12 = vmul.f32 %v1663_v10, %v1651_v9 }
 0x37b   :  { %v1669_v11 = vadd.f32 %v1666_v6, %v1665_v5  ;;  %v1668_v13 = vmul.f32 %v1664_v8, %v1652_v7 }
 0x37d   :  { %1670 = vadd.xlane.f32.xlu1 %v1669_v11  ;;  %v1672_v14 = vadd.f32 %v1668_v13, %v1667_v12 }
 0x381   :  { %1673 = vadd.xlane.f32.xlu1 %v1672_v14 }
 0x406   :  { %v1671_v16 = vpop.xlane.xlu1 %1670 }
 0x407   :  { %v1676_v17 = vmul.f32 0.00390625, %v1671_v16 }
 0x409   :  { %v1678_v18 = vsub.f32 %v1665_v5, %v1676_v17  ;;  %v1679_v20 = vsub.f32 %v1666_v6, %v1676_v17 }
 0x40a   :  { %v1674_v23 = vpop.xlane.xlu1 %1673 }
 0x40b   :  { %v1677_v24 = vmul.f32 0.00390625, %v1674_v23  ;;  %v1682_v25 = vmul.f32 %v1678_v18, %v1678_v18  ;;  %v1683_v26 = vmul.f32 %v1679_v20, %v1679_v20 }
 0x40d   :  { %v1680_v28 = vsub.f32 %v1667_v12, %v1677_v24  ;;  %v1681_v30 = vsub.f32 %v1668_v13, %v1677_v24  ;;  %v1686_v27 = vadd.f32 %v1683_v26, %v1682_v25  ;;  %v1762_v12 = vsub.s32 4, %v2634_v33 }
 0x40f   :  { %1687 = vadd.xlane.f32.xlu0 %v1686_v27  ;;  %v1684_v31 = vmul.f32 %v1680_v28, %v1680_v28  ;;  %v1685_v29 = vmul.f32 %v1681_v30, %v1681_v30  ;;  %v1763_v19 = vrot.slane %v2985_v22, %v1762_v12 }
 0x411   :  { %v1689_v32 = vadd.f32 %v1685_v29, %v1684_v31 }
 0x413   :  { %1690 = vadd.xlane.f32.xlu1 %v1689_v32 }
 0x498   :  { %v1688_v49 = vpop.xlane.xlu0 %1687 }
 0x499   :  { %v1692_v50 = vmul.f32 0.00390625, %v1688_v49 }
 0x49b   :  { %v1694_v51 = vadd.f32 1e-05, %v1692_v50 }
 0x49c   :  { %v1691_v52 = vpop.xlane.xlu1 %1690 }
 0x49d   :  { %2438 = vrsqrt.f32 %v1694_v51  ;;  %v1693_v53 = vmul.f32 0.00390625, %v1691_v52 }
 0x49f   :  { %v1695_v54 = vadd.f32 1e-05, %v1693_v53 }
 0x4a1   :  { %2440 = vrsqrt.f32 %v1695_v54 }
 0x4aa   :  { %v2439_v56 = vpop.eup %2438 }
 0x4ab   :  { %v1699_v58 = vmul.f32 %v2439_v56, %v1679_v20  ;;  %v1698_v60 = vmul.f32 %v2439_v56, %v1678_v18 }
 0x4ad   :  { %v1711_v2 = vmul.f32 %v1709_v59, %v1699_v58  ;;  %v1710_v4 = vmul.f32 %v1705_v61, %v1698_v60 }
 0x4ae   :  { %v2441_v62 = vpop.eup %2440 }
 0x4af   :  { %v1701_v1 = vmul.f32 %v2441_v62, %v1681_v30  ;;  %v1700_v3 = vmul.f32 %v2441_v62, %v1680_v28  ;;  %v1723_v6 = vadd.f32 %v1721_v63, %v1711_v2  ;;  %v1722_v10 = vadd.f32 %v1717_v0, %v1710_v4 }
 0x4b1   :  { %v1713_v5 = vmul.f32 %v1709_v59, %v1701_v1  ;;  %v1712_v21 = vmul.f32 %v1705_v61, %v1700_v3 }
 0x4b3   :  { %v1725_v9 = vadd.f32 %v1721_v63, %v1713_v5  ;;  %v1724_v7 = vadd.f32 %v1717_v0, %v1712_v21 }
 0x4b5   :  { %v1727_v8 = vpack.c.bf16 %v1725_v9, %v1723_v6  ;;  %v1726_v11 = vpack.c.bf16 %v1724_v7, %v1722_v10 }
 0x4b7   :  { %1892 = vmatprep.mubr.bf16.mxu1 %v1727_v8 }
 0x4b8   :  { %1893 = vmatmul.mubr.bf16.vlgmr.msra.gmra.mxu1 %v1726_v11 }
 0x578   :  { %v2205_v13 = vpop.f32.mrf.mxu1 }
 0x57a   :  { %v2206_v14 = vpop.f32.mrf.mxu1 }
 0x57b   :  { %v2207_v15 = vadd.f32 %v2206_v14, %v2205_v13 }
 0x57c   :  { %v2208_v16 = vpop.f32.mrf.mxu1 }
 0x57d   :  { %v1895_v17 = vadd.f32 %v2207_v15, %v1763_v19 }
 0x57e   :  { %v2209_v18 = vpop.f32.mrf.mxu1 }
 0x57f   :  { %1901 = vst [vmem:[#allocation4] sm:$0xff] %v1895_v17  ;;  %v2210_v20 = vadd.f32 %v2209_v18, %v2208_v16 }
 0x581   :  { %v1898_v23 = vadd.f32 %v2210_v20, %v1763_v19 }
 0x583   :  { %1902 = vst [vmem:[#allocation4 + $0x8] sm:$0xff] %v1898_v23 }
 0x584   :  { %2465 = shalt.err (!%p2462_p9)
}
 0x585   :  { %s2483_s3 = smov 128   ;;  %s2484_s2 = smov 8  }
 0x586   :  { %1914 = dma.vmem_to_hbm [thread:$0]  %s1909_s11, 256, %s3152_s9, [#allocation5], %s2483_s3, %s2483_s3, %s2484_s2  }
 0x587   :  { %2476 = dma.done.wait [#allocation5], 256  }
 0x588   :  { %2477 = vsyncadd [#allocation5], 4294967040 }
 0x589   :  { %1918 = vsyncpa [#allocation5], 1 }

</bundles_post_ra>
